<compile_context>
chip_gen: v7x
topology: tpu7x:2x2x1
jax: 0.10.0
libtpu: 0.0.40
codegen_flags: <defaults>
</compile_context>

<pallas_src>
import functools

import jax
import jax.numpy as jnp
from jax.experimental import pallas as pl
from jax.experimental.pallas import tpu as pltpu


def _cam_encode_kernel(x_ref, w_ref, out_ref, *, D, C):
    # x_ref:   (1, Kpad, THW)      pixel tile, pixels on lanes; row Cin is all-ones (bias),
    #                              remaining rows are zero padding.
    # w_ref:   (C*D + D, Kpad)     expanded 1x1-conv weight (bias folded in as a column):
    #                                rows [0, C*D)       -> w_feat[j // D]  (repeated D times)
    #                                rows [C*D, C*D + D) -> w_depth         (true depth logits)
    # out_ref: (1, C*D, THW)       out[c*D + d, p] = feat[c, p] * softmax_d(depth_logit)[d, p]
    CD = C * D
    x = x_ref[0]                                                  # (Kpad, THW)
    w = w_ref[...]                                                # (CD + D, Kpad)

    # 1x1 conv == matmul over channels; bias comes from the ones-row x bias-column.
    y = jnp.dot(w, x, preferred_element_type=jnp.float32)        # (CD + D, THW)

    # Softmax over the D depth bins only (D rows, not C*D).
    logits = y[CD:]                                               # (D, THW)
    m = jnp.max(logits, axis=0, keepdims=True)                    # (1, THW)
    e = jnp.exp(logits - m)                                       # (D, THW)
    s = jnp.sum(e, axis=0, keepdims=True)                         # (1, THW)
    depth = e * pl.reciprocal(s, approx=False)                    # exact; kernel is memory-bound

    # Slab-wise product straight into the output block: row c*D + d = feat[c] * depth[d].
    # y[c*D:(c+1)*D] holds feat[c] repeated D times, so this is a full-vreg elementwise mul.
    for c in range(C):
        out_ref[0, c * D:(c + 1) * D, :] = (
            y[c * D:(c + 1) * D] * depth).astype(out_ref.dtype)


def _pick_tile_hw(hw_pad, max_tile):
    # Largest multiple of 128 that divides hw_pad, capped at max_tile (hw_pad % 128 == 0).
    best = 128
    t = 128
    limit = min(hw_pad, max_tile)
    while t <= limit:
        if hw_pad % t == 0:
            best = t
        t += 128
    return best


def cam_encode_forward(x_nchw, weight, bias, D, C, *,
                       max_tile_hw=2048, out_dtype=jnp.float32):
    """x_nchw: (B, Cin, H, W) f32; weight: (D+C, Cin); bias: (D+C,).

    Returns (B, C, D, H, W), matching CamEncode.forward.
    """
    B, Cin, H, W = x_nchw.shape
    HW = H * W
    CD = C * D

    # Pad pixels to a multiple of 128 (lane-dense unmasked stores) and channels+ones-row
    # to a full sublane group of 8.
    HW_pad = ((HW + 127) // 128) * 128
    Kpad = ((Cin + 1 + 7) // 8) * 8

    tile_hw = _pick_tile_hw(HW_pad, max_tile_hw)
    # v7x has 2 TensorCores: make sure the parallel grid has >= 2 steps when possible.
    if B * (HW_pad // tile_hw) < 2 and HW_pad >= 256:
        tile_hw = _pick_tile_hw(HW_pad, HW_pad // 2)

    # Augmented input (B, Kpad, HW_pad): original channels, then an all-ones bias row,
    # then zero rows up to Kpad. Padded pixel columns produce garbage that is sliced off.
    x_flat = x_nchw.reshape(B, Cin, HW).astype(jnp.float32)
    if HW_pad != HW:
        x_flat = jnp.pad(x_flat, ((0, 0), (0, 0), (0, HW_pad - HW)))
    parts = [x_flat, jnp.ones((B, 1, HW_pad), jnp.float32)]
    pad_rows = Kpad - Cin - 1
    if pad_rows:
        parts.append(jnp.zeros((B, pad_rows, HW_pad), jnp.float32))
    x_aug = jnp.concatenate(parts, axis=1)

    # Expanded weight with bias folded in as column index Cin:
    #   rows [0, CD):      feat row c = j // D, repeated D times (final row order c*D + d)
    #   rows [CD, CD + D): the D depth-logit rows (softmax is computed on these only)
    w_depth, w_feat = weight[:D], weight[D:D + C]
    b_depth, b_feat = bias[:D], bias[D:D + C]
    w_rows = jnp.concatenate([jnp.repeat(w_feat, D, axis=0), w_depth], axis=0)      # (CD+D, Cin)
    b_col = jnp.concatenate([jnp.repeat(b_feat, D), b_depth], axis=0)[:, None]      # (CD+D, 1)
    w_parts = [w_rows, b_col]
    pad_cols = Kpad - Cin - 1
    if pad_cols:
        w_parts.append(jnp.zeros((CD + D, pad_cols), jnp.float32))
    w_aug = jnp.concatenate(w_parts, axis=1).astype(jnp.float32)                    # (CD+D, Kpad)

    kernel = functools.partial(_cam_encode_kernel, D=D, C=C)

    out_flat = pl.pallas_call(
        kernel,
        out_shape=jax.ShapeDtypeStruct((B, CD, HW_pad), out_dtype),
        grid_spec=pltpu.PrefetchScalarGridSpec(
            num_scalar_prefetch=0,
            grid=(B, HW_pad // tile_hw),
            in_specs=[
                pl.BlockSpec((1, Kpad, tile_hw), lambda b, i: (b, 0, i)),   # pixel tile
                pl.BlockSpec((CD + D, Kpad), lambda b, i: (0, 0)),          # full expanded weight
            ],
            out_specs=pl.BlockSpec((1, CD, tile_hw), lambda b, i: (b, 0, i)),
        ),
        compiler_params=pltpu.CompilerParams(
            dimension_semantics=("parallel", "parallel"),
            vmem_limit_bytes=48 * 1024 * 1024),
    )(x_aug, w_aug)

    if HW_pad != HW:
        out_flat = out_flat[:, :, :HW]
    # (B, C*D, H*W) -> (B, C, D, H, W): free reshape, row c*D + d maps to (c, d).
    return out_flat.reshape(B, C, D, H, W)


def _reference(x_nchw, weight, bias, D, C):
    # Pure-JAX reference mirroring the PyTorch module.
    y = jnp.einsum("bihw,oi->bohw", x_nchw, weight,
                   precision=jax.lax.Precision.HIGHEST) + bias[None, :, None, None]
    depth = jax.nn.softmax(y[:, :D], axis=1)                        # (B, D, H, W)
    feat = y[:, D:D + C]                                            # (B, C, H, W)
    return depth[:, None, :, :, :] * feat[:, :, None, :, :]         # (B, C, D, H, W)


if __name__ == "__main__":
    # Small shapes consistent with the module: Cin=4, D=8, C=16.
    D, C = 8, 16
    Cin = 4

    key = jax.random.PRNGKey(0)
    kx, kw, kb, kx2 = jax.random.split(key, 4)
    weight = 0.1 * jax.random.normal(kw, (D + C, Cin), dtype=jnp.float32)
    bias = 0.05 * jax.random.normal(kb, (D + C,), dtype=jnp.float32)

    fwd = jax.jit(cam_encode_forward, static_argnums=(3, 4))

    # Case 1: B=2, 16x16 (H*W already a multiple of 128).
    B, H, W = 2, 16, 16
    x = jax.random.normal(kx, (B, Cin, H, W), dtype=jnp.float32)
    out = jax.block_until_ready(fwd(x, weight, bias, D, C))
    ref = _reference(x, weight, bias, D, C)
    assert out.shape == (B, C, D, H, W)
    assert jnp.allclose(out, ref, rtol=1e-2, atol=1e-5), float(jnp.max(jnp.abs(out - ref)))

    # Case 2: ragged LSS-style map (8x22 = 176 pixels -> padded to 256) with B=1
    # (also exercises the >=2-grid-step split for the v7x dual-TensorCore path).
    B2, H2, W2 = 1, 8, 22
    x2 = jax.random.normal(kx2, (B2, Cin, H2, W2), dtype=jnp.float32)
    out2 = jax.block_until_ready(fwd(x2, weight, bias, D, C))
    ref2 = _reference(x2, weight, bias, D, C)
    assert out2.shape == (B2, C, D, H2, W2)
    assert jnp.allclose(out2, ref2, rtol=1e-2, atol=1e-5), float(jnp.max(jnp.abs(out2 - ref2)))

    print("KERNEL_OK")
</pallas_src>

<mosaic_0001>
module attributes {stable_mosaic.version = 11 : i64} {
  func.func @_cam_encode_kernel(%arg0: i32, %arg1: i32, %arg2: memref<1x8x256xf32, #tpu.memory_space<vmem>>, %arg3: memref<136x8xf32, #tpu.memory_space<vmem>>, %arg4: memref<1x128x256xf32, #tpu.memory_space<vmem>>) attributes {dimension_semantics = [#tpu.dimension_semantics<parallel>, #tpu.dimension_semantics<parallel>], iteration_bounds = array<i64: 2, 1>, scalar_prefetch = 0 : i64, scratch_operands = 0 : i64, tpu.core_type = #tpu.core_type<tc>, window_params = [{transform_indices = @transform_0, window_bounds = array<i64: 1, 8, 256>}, {pipeline_mode = #tpu.pipeline_mode<synchronous>, transform_indices = @transform_1, window_bounds = array<i64: 136, 8>}, {transform_indices = @transform_2, window_bounds = array<i64: 1, 128, 256>}]} {
    %c0 = arith.constant 0 : index
    %c0_0 = arith.constant 0 : index
    %c0_1 = arith.constant 0 : index
    %0 = vector.load %arg2[%c0, %c0_0, %c0_1] : memref<1x8x256xf32, #tpu.memory_space<vmem>>, vector<1x8x256xf32>
    %1 = vector.shape_cast %0 : vector<1x8x256xf32> to vector<8x256xf32>
    %c0_2 = arith.constant 0 : index
    %c0_3 = arith.constant 0 : index
    %2 = vector.load %arg3[%c0_2, %c0_3] : memref<136x8xf32, #tpu.memory_space<vmem>>, vector<136x8xf32>
    %cst = arith.constant dense<0.000000e+00> : vector<136x256xf32>
    %3 = tpu.matmul %2, %1, %cst {dimension_numbers = #tpu.dot_dimension_numbers<[1], [0], [0], [1], [0, 0, 1, 1], [], []>} : vector<136x8xf32>, vector<8x256xf32>, vector<136x256xf32> -> vector<136x256xf32>
    %4 = vector.extract_strided_slice %3 {offsets = [128, 0], sizes = [8, 256], strides = [1, 1]} : vector<136x256xf32> to vector<8x256xf32>
    %cst_4 = arith.constant dense<0xFF800000> : vector<256xf32>
    %5 = vector.multi_reduction <maximumf>, %4, %cst_4 [0] : vector<8x256xf32> to vector<256xf32>
    %6 = vector.shape_cast %5 : vector<256xf32> to vector<1x256xf32>
    %7 = vector.broadcast %6 : vector<1x256xf32> to vector<8x256xf32>
    %8 = arith.subf %4, %7 : vector<8x256xf32>
    %9 = math.exp %8 : vector<8x256xf32>
    %cst_5 = arith.constant dense<0.000000e+00> : vector<256xf32>
    %10 = vector.multi_reduction <add>, %9, %cst_5 [0] : vector<8x256xf32> to vector<256xf32>
    %11 = vector.shape_cast %10 : vector<256xf32> to vector<1x256xf32>
    %12 = tpu.reciprocal %11 : vector<1x256xf32> -> vector<1x256xf32>
    %13 = vector.broadcast %12 : vector<1x256xf32> to vector<8x256xf32>
    %14 = arith.mulf %9, %13 : vector<8x256xf32>
    %15 = vector.extract_strided_slice %3 {offsets = [0, 0], sizes = [8, 256], strides = [1, 1]} : vector<136x256xf32> to vector<8x256xf32>
    %16 = arith.mulf %15, %14 : vector<8x256xf32>
    %c0_6 = arith.constant 0 : index
    %c0_7 = arith.constant 0 : index
    %c0_8 = arith.constant 0 : index
    %17 = vector.load %arg4[%c0_6, %c0_7, %c0_8] : memref<1x128x256xf32, #tpu.memory_space<vmem>>, vector<1x8x256xf32>
    %18 = vector.shape_cast %17 : vector<1x8x256xf32> to vector<8x256xf32>
    %19 = vector.shape_cast %16 : vector<8x256xf32> to vector<1x8x256xf32>
    tpu.vector_store %arg4[%c0_6, %c0_7, %c0_8], %19 {strides = array<i32>} : memref<1x128x256xf32, #tpu.memory_space<vmem>>, vector<1x8x256xf32>,
    %20 = vector.extract_strided_slice %3 {offsets = [8, 0], sizes = [8, 256], strides = [1, 1]} : vector<136x256xf32> to vector<8x256xf32>
    %21 = arith.mulf %20, %14 : vector<8x256xf32>
    %c0_9 = arith.constant 0 : index
    %c8 = arith.constant 8 : index
    %c0_10 = arith.constant 0 : index
    %22 = vector.load %arg4[%c0_9, %c8, %c0_10] : memref<1x128x256xf32, #tpu.memory_space<vmem>>, vector<1x8x256xf32>
    %23 = vector.shape_cast %22 : vector<1x8x256xf32> to vector<8x256xf32>
    %24 = vector.shape_cast %21 : vector<8x256xf32> to vector<1x8x256xf32>
    tpu.vector_store %arg4[%c0_9, %c8, %c0_10], %24 {strides = array<i32>} : memref<1x128x256xf32, #tpu.memory_space<vmem>>, vector<1x8x256xf32>,
    %25 = vector.extract_strided_slice %3 {offsets = [16, 0], sizes = [8, 256], strides = [1, 1]} : vector<136x256xf32> to vector<8x256xf32>
    %26 = arith.mulf %25, %14 : vector<8x256xf32>
    %c0_11 = arith.constant 0 : index
    %c16 = arith.constant 16 : index
    %c0_12 = arith.constant 0 : index
    %27 = vector.load %arg4[%c0_11, %c16, %c0_12] : memref<1x128x256xf32, #tpu.memory_space<vmem>>, vector<1x8x256xf32>
    %28 = vector.shape_cast %27 : vector<1x8x256xf32> to vector<8x256xf32>
    %29 = vector.shape_cast %26 : vector<8x256xf32> to vector<1x8x256xf32>
    tpu.vector_store %arg4[%c0_11, %c16, %c0_12], %29 {strides = array<i32>} : memref<1x128x256xf32, #tpu.memory_space<vmem>>, vector<1x8x256xf32>,
    %30 = vector.extract_strided_slice %3 {offsets = [24, 0], sizes = [8, 256], strides = [1, 1]} : vector<136x256xf32> to vector<8x256xf32>
    %31 = arith.mulf %30, %14 : vector<8x256xf32>
    %c0_13 = arith.constant 0 : index
    %c24 = arith.constant 24 : index
    %c0_14 = arith.constant 0 : index
    %32 = vector.load %arg4[%c0_13, %c24, %c0_14] : memref<1x128x256xf32, #tpu.memory_space<vmem>>, vector<1x8x256xf32>
    %33 = vector.shape_cast %32 : vector<1x8x256xf32> to vector<8x256xf32>
    %34 = vector.shape_cast %31 : vector<8x256xf32> to vector<1x8x256xf32>
    tpu.vector_store %arg4[%c0_13, %c24, %c0_14], %34 {strides = array<i32>} : memref<1x128x256xf32, #tpu.memory_space<vmem>>, vector<1x8x256xf32>,
    %35 = vector.extract_strided_slice %3 {offsets = [32, 0], sizes = [8, 256], strides = [1, 1]} : vector<136x256xf32> to vector<8x256xf32>
    %36 = arith.mulf %35, %14 : vector<8x256xf32>
    %c0_15 = arith.constant 0 : index
    %c32 = arith.constant 32 : index
    %c0_16 = arith.constant 0 : index
    %37 = vector.load %arg4[%c0_15, %c32, %c0_16] : memref<1x128x256xf32, #tpu.memory_space<vmem>>, vector<1x8x256xf32>
    %38 = vector.shape_cast %37 : vector<1x8x256xf32> to vector<8x256xf32>
    %39 = vector.shape_cast %36 : vector<8x256xf32> to vector<1x8x256xf32>
    tpu.vector_store %arg4[%c0_15, %c32, %c0_16], %39 {strides = array<i32>} : memref<1x128x256xf32, #tpu.memory_space<vmem>>, vector<1x8x256xf32>,
    %40 = vector.extract_strided_slice %3 {offsets = [40, 0], sizes = [8, 256], strides = [1, 1]} : vector<136x256xf32> to vector<8x256xf32>
    %41 = arith.mulf %40, %14 : vector<8x256xf32>
    %c0_17 = arith.constant 0 : index
    %c40 = arith.constant 40 : index
    %c0_18 = arith.constant 0 : index
    %42 = vector.load %arg4[%c0_17, %c40, %c0_18] : memref<1x128x256xf32, #tpu.memory_space<vmem>>, vector<1x8x256xf32>
    %43 = vector.shape_cast %42 : vector<1x8x256xf32> to vector<8x256xf32>
    %44 = vector.shape_cast %41 : vector<8x256xf32> to vector<1x8x256xf32>
    tpu.vector_store %arg4[%c0_17, %c40, %c0_18], %44 {strides = array<i32>} : memref<1x128x256xf32, #tpu.memory_space<vmem>>, vector<1x8x256xf32>,
    %45 = vector.extract_strided_slice %3 {offsets = [48, 0], sizes = [8, 256], strides = [1, 1]} : vector<136x256xf32> to vector<8x256xf32>
    %46 = arith.mulf %45, %14 : vector<8x256xf32>
    %c0_19 = arith.constant 0 : index
    %c48 = arith.constant 48 : index
    %c0_20 = arith.constant 0 : index
    %47 = vector.load %arg4[%c0_19, %c48, %c0_20] : memref<1x128x256xf32, #tpu.memory_space<vmem>>, vector<1x8x256xf32>
    %48 = vector.shape_cast %47 : vector<1x8x256xf32> to vector<8x256xf32>
    %49 = vector.shape_cast %46 : vector<8x256xf32> to vector<1x8x256xf32>
    tpu.vector_store %arg4[%c0_19, %c48, %c0_20], %49 {strides = array<i32>} : memref<1x128x256xf32, #tpu.memory_space<vmem>>, vector<1x8x256xf32>,
    %50 = vector.extract_strided_slice %3 {offsets = [56, 0], sizes = [8, 256], strides = [1, 1]} : vector<136x256xf32> to vector<8x256xf32>
    %51 = arith.mulf %50, %14 : vector<8x256xf32>
    %c0_21 = arith.constant 0 : index
    %c56 = arith.constant 56 : index
    %c0_22 = arith.constant 0 : index
    %52 = vector.load %arg4[%c0_21, %c56, %c0_22] : memref<1x128x256xf32, #tpu.memory_space<vmem>>, vector<1x8x256xf32>
    %53 = vector.shape_cast %52 : vector<1x8x256xf32> to vector<8x256xf32>
    %54 = vector.shape_cast %51 : vector<8x256xf32> to vector<1x8x256xf32>
    tpu.vector_store %arg4[%c0_21, %c56, %c0_22], %54 {strides = array<i32>} : memref<1x128x256xf32, #tpu.memory_space<vmem>>, vector<1x8x256xf32>,
    %55 = vector.extract_strided_slice %3 {offsets = [64, 0], sizes = [8, 256], strides = [1, 1]} : vector<136x256xf32> to vector<8x256xf32>
    %56 = arith.mulf %55, %14 : vector<8x256xf32>
    %c0_23 = arith.constant 0 : index
    %c64 = arith.constant 64 : index
    %c0_24 = arith.constant 0 : index
    %57 = vector.load %arg4[%c0_23, %c64, %c0_24] : memref<1x128x256xf32, #tpu.memory_space<vmem>>, vector<1x8x256xf32>
    %58 = vector.shape_cast %57 : vector<1x8x256xf32> to vector<8x256xf32>
    %59 = vector.shape_cast %56 : vector<8x256xf32> to vector<1x8x256xf32>
    tpu.vector_store %arg4[%c0_23, %c64, %c0_24], %59 {strides = array<i32>} : memref<1x128x256xf32, #tpu.memory_space<vmem>>, vector<1x8x256xf32>,
    %60 = vector.extract_strided_slice %3 {offsets = [72, 0], sizes = [8, 256], strides = [1, 1]} : vector<136x256xf32> to vector<8x256xf32>
    %61 = arith.mulf %60, %14 : vector<8x256xf32>
    %c0_25 = arith.constant 0 : index
    %c72 = arith.constant 72 : index
    %c0_26 = arith.constant 0 : index
    %62 = vector.load %arg4[%c0_25, %c72, %c0_26] : memref<1x128x256xf32, #tpu.memory_space<vmem>>, vector<1x8x256xf32>
    %63 = vector.shape_cast %62 : vector<1x8x256xf32> to vector<8x256xf32>
    %64 = vector.shape_cast %61 : vector<8x256xf32> to vector<1x8x256xf32>
    tpu.vector_store %arg4[%c0_25, %c72, %c0_26], %64 {strides = array<i32>} : memref<1x128x256xf32, #tpu.memory_space<vmem>>, vector<1x8x256xf32>,
    %65 = vector.extract_strided_slice %3 {offsets = [80, 0], sizes = [8, 256], strides = [1, 1]} : vector<136x256xf32> to vector<8x256xf32>
    %66 = arith.mulf %65, %14 : vector<8x256xf32>
    %c0_27 = arith.constant 0 : index
    %c80 = arith.constant 80 : index
    %c0_28 = arith.constant 0 : index
    %67 = vector.load %arg4[%c0_27, %c80, %c0_28] : memref<1x128x256xf32, #tpu.memory_space<vmem>>, vector<1x8x256xf32>
    %68 = vector.shape_cast %67 : vector<1x8x256xf32> to vector<8x256xf32>
    %69 = vector.shape_cast %66 : vector<8x256xf32> to vector<1x8x256xf32>
    tpu.vector_store %arg4[%c0_27, %c80, %c0_28], %69 {strides = array<i32>} : memref<1x128x256xf32, #tpu.memory_space<vmem>>, vector<1x8x256xf32>,
    %70 = vector.extract_strided_slice %3 {offsets = [88, 0], sizes = [8, 256], strides = [1, 1]} : vector<136x256xf32> to vector<8x256xf32>
    %71 = arith.mulf %70, %14 : vector<8x256xf32>
    %c0_29 = arith.constant 0 : index
    %c88 = arith.constant 88 : index
    %c0_30 = arith.constant 0 : index
    %72 = vector.load %arg4[%c0_29, %c88, %c0_30] : memref<1x128x256xf32, #tpu.memory_space<vmem>>, vector<1x8x256xf32>
    %73 = vector.shape_cast %72 : vector<1x8x256xf32> to vector<8x256xf32>
    %74 = vector.shape_cast %71 : vector<8x256xf32> to vector<1x8x256xf32>
    tpu.vector_store %arg4[%c0_29, %c88, %c0_30], %74 {strides = array<i32>} : memref<1x128x256xf32, #tpu.memory_space<vmem>>, vector<1x8x256xf32>,
    %75 = vector.extract_strided_slice %3 {offsets = [96, 0], sizes = [8, 256], strides = [1, 1]} : vector<136x256xf32> to vector<8x256xf32>
    %76 = arith.mulf %75, %14 : vector<8x256xf32>
    %c0_31 = arith.constant 0 : index
    %c96 = arith.constant 96 : index
    %c0_32 = arith.constant 0 : index
    %77 = vector.load %arg4[%c0_31, %c96, %c0_32] : memref<1x128x256xf32, #tpu.memory_space<vmem>>, vector<1x8x256xf32>
    %78 = vector.shape_cast %77 : vector<1x8x256xf32> to vector<8x256xf32>
    %79 = vector.shape_cast %76 : vector<8x256xf32> to vector<1x8x256xf32>
    tpu.vector_store %arg4[%c0_31, %c96, %c0_32], %79 {strides = array<i32>} : memref<1x128x256xf32, #tpu.memory_space<vmem>>, vector<1x8x256xf32>,
    %80 = vector.extract_strided_slice %3 {offsets = [104, 0], sizes = [8, 256], strides = [1, 1]} : vector<136x256xf32> to vector<8x256xf32>
    %81 = arith.mulf %80, %14 : vector<8x256xf32>
    %c0_33 = arith.constant 0 : index
    %c104 = arith.constant 104 : index
    %c0_34 = arith.constant 0 : index
    %82 = vector.load %arg4[%c0_33, %c104, %c0_34] : memref<1x128x256xf32, #tpu.memory_space<vmem>>, vector<1x8x256xf32>
    %83 = vector.shape_cast %82 : vector<1x8x256xf32> to vector<8x256xf32>
    %84 = vector.shape_cast %81 : vector<8x256xf32> to vector<1x8x256xf32>
    tpu.vector_store %arg4[%c0_33, %c104, %c0_34], %84 {strides = array<i32>} : memref<1x128x256xf32, #tpu.memory_space<vmem>>, vector<1x8x256xf32>,
    %85 = vector.extract_strided_slice %3 {offsets = [112, 0], sizes = [8, 256], strides = [1, 1]} : vector<136x256xf32> to vector<8x256xf32>
    %86 = arith.mulf %85, %14 : vector<8x256xf32>
    %c0_35 = arith.constant 0 : index
    %c112 = arith.constant 112 : index
    %c0_36 = arith.constant 0 : index
    %87 = vector.load %arg4[%c0_35, %c112, %c0_36] : memref<1x128x256xf32, #tpu.memory_space<vmem>>, vector<1x8x256xf32>
    %88 = vector.shape_cast %87 : vector<1x8x256xf32> to vector<8x256xf32>
    %89 = vector.shape_cast %86 : vector<8x256xf32> to vector<1x8x256xf32>
    tpu.vector_store %arg4[%c0_35, %c112, %c0_36], %89 {strides = array<i32>} : memref<1x128x256xf32, #tpu.memory_space<vmem>>, vector<1x8x256xf32>,
    %90 = vector.extract_strided_slice %3 {offsets = [120, 0], sizes = [8, 256], strides = [1, 1]} : vector<136x256xf32> to vector<8x256xf32>
    %91 = arith.mulf %90, %14 : vector<8x256xf32>
    %c0_37 = arith.constant 0 : index
    %c120 = arith.constant 120 : index
    %c0_38 = arith.constant 0 : index
    %92 = vector.load %arg4[%c0_37, %c120, %c0_38] : memref<1x128x256xf32, #tpu.memory_space<vmem>>, vector<1x8x256xf32>
    %93 = vector.shape_cast %92 : vector<1x8x256xf32> to vector<8x256xf32>
    %94 = vector.shape_cast %91 : vector<8x256xf32> to vector<1x8x256xf32>
    tpu.vector_store %arg4[%c0_37, %c120, %c0_38], %94 {strides = array<i32>} : memref<1x128x256xf32, #tpu.memory_space<vmem>>, vector<1x8x256xf32>,
    return
  }
  func.func @transform_0(%arg0: i32, %arg1: i32) -> (i32, i32, i32) {
    %c0_i32 = arith.constant 0 : i32
    %c0_i32_0 = arith.constant 0 : i32
    return %arg0, %c0_i32, %arg1 : i32, i32, i32
  }
  func.func @transform_1(%arg0: i32, %arg1: i32) -> (i32, i32) {
    %c0_i32 = arith.constant 0 : i32
    %c0_i32_0 = arith.constant 0 : i32
    %c0_i32_1 = arith.constant 0 : i32
    return %c0_i32, %c0_i32_0 : i32, i32
  }
  func.func @transform_2(%arg0: i32, %arg1: i32) -> (i32, i32, i32) {
    %c0_i32 = arith.constant 0 : i32
    %c0_i32_0 = arith.constant 0 : i32
    return %arg0, %c0_i32, %arg1 : i32, i32, i32
  }
}

</mosaic_0001>

<bundles_post_ra>
// kernel: cam_encode_forward.1
= control target key start
LH: loop header
LB: loop body
LE: loop exit
PB: predicated region body
PF: predicated region fallthrough
CT: control target
= control target key end

     0   :  { %s711_s9 = smov 0   ;;  %s713_s10 = smov 0   ;;  %s937_s0 = inlined_call_operand.vmem [shape: f32[2,8,256], index: 0, kind: input, shape index: {}]   ;;  %s938_s1 = inlined_call_operand.vmem [shape: f32[136,8], index: 1, kind: input, shape index: {}]   ;;  %s939_s2 = inlined_call_operand.vmem [shape: f32[2,128,256], index: 2, kind: output, shape index: {}]  }
   0x1   :  { %s715_s11 = smov 0  }
   0x2 LB: > { %s24_s12 = sadd.s32 1, %s689_s10  ;;  %p610_p0 = scmp.ge.s32.totalorder %s693_s11, 1  ;;  %s693_s11 = sphi %s715_s11, %s12_s11   ;;  %s689_s10 = sphi %s713_s10, %s941_s10   ;;  %s685_s9 = sphi %s711_s9, %s940_s9  }
   0x3   : > { %p26_p1 = scmp.ge.s32.totalorder %s24_s12, 2  ;;  %p133_p2 = scmp.lt.s32.totalorder %s693_s11, 3 }
   0x5   : > { %s943_s12 = smov (%p26_p1, %s24_s12), 0  ;;  %p134_p3 = pnand %p610_p0, %p133_p2 }
   0x6   : > { %p164_p4 = scmp.lt.s32.totalorder (!%p134_p3), %s685_s9, 1  ;;  %v695_v0 = vmov (!%p134_p3), 0.0   ;;  %v194_v1 = vld [vmem:[%s938_s1 + $0x48] sm:$0xff] (!%p134_p3)  ;;  %vm202_vm0 = vcmask (!%p134_p3), 64512   ;;  %v185_v4 = vld [vmem:[%s938_s1] sm:$0xff] (!%p134_p3)  ;;  %v195_v5 = vld [vmem:[%s938_s1 + $0x50] sm:$0xff] (!%p134_p3) }
   0x7   : > { %137 = sbr.rel (%p134_p3) target bundleno = 330 (0x14a), region = 28  ;;  %372 = vmatprep.mubr.f32.mxu1 (!%p134_p3), %v695_v0  ;;  %318 = vmatprep.mubr.f32.mxu0 (!%p134_p3), %v695_v0  ;;  %v186_v6 = vld [vmem:[%s938_s1 + $0x8] sm:$0xff] (!%p134_p3)  ;;  %v196_v7 = vld [vmem:[%s938_s1 + $0x58] sm:$0xff] (!%p134_p3)  ;;  %v187_v8 = vld [vmem:[%s938_s1 + $0x10] sm:$0xff] (!%p134_p3) }
   0x8   : > { %v197_v9 = vld [vmem:[%s938_s1 + $0x60] sm:$0xff] (!%p134_p3)  ;;  %v188_v10 = vld [vmem:[%s938_s1 + $0x18] sm:$0xff] (!%p134_p3)  ;;  %v198_v11 = vld [vmem:[%s938_s1 + $0x68] sm:$0xff] (!%p134_p3) }
   0x9   : > { %v189_v12 = vld [vmem:[%s938_s1 + $0x20] sm:$0xff] (!%p134_p3)  ;;  %v199_v13 = vld [vmem:[%s938_s1 + $0x70] sm:$0xff] (!%p134_p3)  ;;  %v190_v14 = vld [vmem:[%s938_s1 + $0x28] sm:$0xff] (!%p134_p3) }
   0xa   : > { %v200_v15 = vld [vmem:[%s938_s1 + $0x78] sm:$0xff] (!%p134_p3)  ;;  %v191_v16 = vld [vmem:[%s938_s1 + $0x30] sm:$0xff] (!%p134_p3)  ;;  %v201_v17 = vld [vmem:[%s938_s1 + $0x80] sm:$0xff] (!%p134_p3) }
   0xb   : > { %v192_v18 = vld [vmem:[%s938_s1 + $0x38] sm:$0xff] (!%p134_p3)  ;;  %v193_v19 = vld [vmem:[%s938_s1 + $0x40] sm:$0xff] (!%p134_p3) }
   0xe   : > { %s945_s9 = smov (!%p164_p4, %s685_s9), 1 }
   0xf   : > { %s634_s13 = sshll.u32 %s945_s9, 4  ;;  %s635_s27 = sshll.u32 %s945_s9, 8 }
  0x10   : > { %s171_s16 = scalar_lea.vmem %s937_s0, %s634_s13  ;;  %s865_s30 = scalar_lea.vmem %s939_s2, %s635_s27 }
  0x11   : > { %v184_v2 = vld [vmem:[%s171_s16 + $0x8] sm:$0xff]  ;;  %v183_v3 = vld [vmem:[%s171_s16] sm:$0xff] }
  0x12   : > { %636 = vmatprep.subr.mxu1 %v184_v2  ;;  %254 = vmatprep.subr.mxu0 %v184_v2 }
  0x13   : > { %637 = vmatpush1.msra.mxu1 %v183_v3  ;;  %255 = vmatpush1.msra.mxu0 %v183_v3 }
  0x14   : > { %624 = vmatmul.mubr.msk.f32.vlgmr.msra.gmra.mrb[0].mxu1 %vm202_vm0, %v194_v1  ;;  %615 = vmatmul.mubr.msk.f32.vlgmr.msra.gmra.mrb[0].mxu0 %vm202_vm0, %v185_v4 }
  0x15   : > { %378 = vmatprep.mubr.f32.mxu1 %v695_v0  ;;  %324 = vmatprep.mubr.f32.mxu0 %v695_v0 }
  0x18   : > { %625 = vmatmul.mubr.msk.f32.gmra.mrb[2].mxu1 %vm202_vm0, %v195_v5  ;;  %616 = vmatmul.mubr.msk.f32.gmra.mrb[2].mxu0 %vm202_vm0, %v186_v6 }
  0x19   : > { %384 = vmatprep.mubr.f32.mxu1 %v695_v0  ;;  %330 = vmatprep.mubr.f32.mxu0 %v695_v0 }
  0x1c   : > { %626 = vmatmul.mubr.msk.f32.gmra.mrb[4].mxu1 %vm202_vm0, %v196_v7  ;;  %617 = vmatmul.mubr.msk.f32.gmra.mrb[4].mxu0 %vm202_vm0, %v187_v8 }
  0x1d   : > { %390 = vmatprep.mubr.f32.mxu1 %v695_v0  ;;  %336 = vmatprep.mubr.f32.mxu0 %v695_v0 }
  0x20   : > { %627 = vmatmul.mubr.msk.f32.gmra.mrb[6].mxu1 %vm202_vm0, %v197_v9  ;;  %618 = vmatmul.mubr.msk.f32.gmra.mrb[6].mxu0 %vm202_vm0, %v188_v10 }
  0x21   : > { %396 = vmatprep.mubr.f32.mxu1 %v695_v0  ;;  %342 = vmatprep.mubr.f32.mxu0 %v695_v0 }
  0x24   : > { %628 = vmatmul.mubr.msk.f32.gmra.mrb[8].mxu1 %vm202_vm0, %v198_v11  ;;  %619 = vmatmul.mubr.msk.f32.gmra.mrb[8].mxu0 %vm202_vm0, %v189_v12 }
  0x25   : > { %402 = vmatprep.mubr.f32.mxu1 %v695_v0  ;;  %348 = vmatprep.mubr.f32.mxu0 %v695_v0 }
  0x28   : > { %629 = vmatmul.mubr.msk.f32.gmra.mrb[10].mxu1 %vm202_vm0, %v199_v13  ;;  %620 = vmatmul.mubr.msk.f32.gmra.mrb[10].mxu0 %vm202_vm0, %v190_v14 }
  0x29   : > { %408 = vmatprep.mubr.f32.mxu1 %v695_v0  ;;  %354 = vmatprep.mubr.f32.mxu0 %v695_v0 }
  0x2c   : > { %630 = vmatmul.mubr.msk.f32.gmra.mrb[12].mxu1 %vm202_vm0, %v200_v15  ;;  %621 = vmatmul.mubr.msk.f32.gmra.mrb[12].mxu0 %vm202_vm0, %v191_v16 }
  0x2d   : > { %414 = vmatprep.mubr.f32.mxu1 %v695_v0  ;;  %360 = vmatprep.mubr.f32.mxu0 %v695_v0 }
  0x30   : > { %631 = vmatmul.mubr.msk.f32.gmra.mrb[14].mxu1 %vm202_vm0, %v201_v17  ;;  %622 = vmatmul.mubr.msk.f32.gmra.mrb[14].mxu0 %vm202_vm0, %v192_v18 }
  0x31   : > { %366 = vmatprep.mubr.f32.mxu0 %v695_v0 }
  0x34   : > { %623 = vmatmul.mubr.msk.f32.gmra.mrb[16].mxu0 %vm202_vm0, %v193_v19 }
  0xe7   : > { %v803_v20 = vpop.f32.mrb[0].mxu1  ;;  %v805_v21 = vpop.f32.mrb[0].mxu0 }
  0xe8   : > { %v807_v22 = vpop.f32.mrb[1].mxu1  ;;  %v809_v23 = vpop.f32.mrb[1].mxu0 }
  0xeb   : > { %v811_v24 = vpop.f32.mrb[2].mxu1  ;;  %v813_v25 = vpop.f32.mrb[2].mxu0 }
  0xec   : > { %v815_v26 = vpop.f32.mrb[3].mxu1  ;;  %v817_v27 = vpop.f32.mrb[3].mxu0 }
  0xef   : > { %v819_v28 = vpop.f32.mrb[4].mxu1  ;;  %v821_v29 = vpop.f32.mrb[4].mxu0 }
  0xf0   : > { %v823_v30 = vpop.f32.mrb[5].mxu1  ;;  %v825_v31 = vpop.f32.mrb[5].mxu0 }
  0xf3   : > { %v827_v32 = vpop.f32.mrb[6].mxu1  ;;  %v829_v33 = vpop.f32.mrb[6].mxu0 }
  0xf4   : > { %v831_v34 = vpop.f32.mrb[7].mxu1  ;;  %v833_v35 = vpop.f32.mrb[7].mxu0 }
  0xf7   : > { %v398_v36 = vpop.f32.mrb[8].mxu1  ;;  %v835_v37 = vpop.f32.mrb[8].mxu0 }
  0xf8   : > { %v837_v38 = vpop.f32.mrb[9].mxu1  ;;  %v839_v39 = vpop.f32.mrb[9].mxu0 }
  0xfb   : > { %v404_v40 = vpop.f32.mrb[10].mxu1  ;;  %v841_v41 = vpop.f32.mrb[10].mxu0 }
  0xfc   : > { %v843_v42 = vpop.f32.mrb[11].mxu1  ;;  %v845_v43 = vpop.f32.mrb[11].mxu0 }
  0xff   : > { %v410_v44 = vpop.f32.mrb[12].mxu1  ;;  %v847_v45 = vpop.f32.mrb[12].mxu0 }
 0x100   : > { %v849_v46 = vpop.f32.mrb[13].mxu1  ;;  %v851_v47 = vpop.f32.mrb[13].mxu0 }
 0x103   : > { %v416_v48 = vpop.f32.mrb[14].mxu1  ;;  %v853_v49 = vpop.f32.mrb[14].mxu0 }
 0x104   : > { %v421_v50 = vrot.slane %v416_v48, 4  ;;  %v418_v51 = vpop.f32.mrb[15].mxu1  ;;  %v855_v52 = vpop.f32.mrb[15].mxu0 }
 0x105   : > { %v427_v53 = vrot.slane %v418_v51, 4 }
 0x106   : > { %v422_v54 = vmax.f32 %v416_v48, %v421_v50 }
 0x107   : > { %v428_v55 = vmax.f32 %v418_v51, %v427_v53  ;;  %v857_v56 = vpop.f32.mrb[16].mxu0 }
 0x108   : > { %v423_v57 = vrot.slane %v422_v54, 2  ;;  %v859_v58 = vpop.f32.mrb[17].mxu0 }
 0x109   : > { %v429_v59 = vrot.slane %v428_v55, 2 }
 0x10a   : > { %v424_v60 = vmax.f32 %v422_v54, %v423_v57 }
 0x10b   : > { %v430_v61 = vmax.f32 %v428_v55, %v429_v59 }
 0x10c   : > { %v425_v62 = vrot.slane %v424_v60, 1 }
 0x10d   : > { %v431_v63 = vrot.slane %v430_v61, 1 }
 0x10e   : > { %v426_v0 = vmax.f32 %v424_v60, %v425_v62 }
 0x10f   : > { %v432_v1 = vmax.f32 %v430_v61, %v431_v63 }
 0x110   : > { %v433_v2 = vsub.f32 %v416_v48, %v426_v0 }
 0x111   : > { %v434_v3 = vsub.f32 %v418_v51, %v432_v1 }
 0x112   : > { %v435_v4 = vmul.f32 1.442695, %v433_v2 }
 0x113   : > { %v437_v5 = vmul.f32 1.442695, %v434_v3 }
 0x114   : > { %663 = vpow2.f32 %v435_v4 }
 0x115   : > { %665 = vpow2.f32 %v437_v5 }
 0x11e   : > { %v664_v6 = vpop.eup %663 }
 0x11f   : > { %v666_v7 = vpop.eup %665  ;;  %v439_v8 = vrot.slane %v664_v6, 4 }
 0x120   : > { %v445_v9 = vrot.slane %v666_v7, 4 }
 0x121   : > { %v440_v10 = vadd.f32 %v664_v6, %v439_v8 }
 0x122   : > { %v446_v11 = vadd.f32 %v666_v7, %v445_v9 }
 0x123   : > { %v441_v12 = vrot.slane %v440_v10, 2 }
 0x124   : > { %v447_v13 = vrot.slane %v446_v11, 2 }
 0x125   : > { %v442_v14 = vadd.f32 %v441_v12, %v440_v10 }
 0x126   : > { %v448_v15 = vadd.f32 %v447_v13, %v446_v11 }
 0x127   : > { %v443_v16 = vrot.slane %v442_v14, 1 }
 0x128   : > { %v449_v17 = vrot.slane %v448_v15, 1 }
 0x129   : > { %v444_v18 = vadd.f32 %v443_v16, %v442_v14 }
 0x12a   : > { %v450_v19 = vadd.f32 %v449_v17, %v448_v15 }
 0x12b   : > { %667 = vrcp.f32 %v444_v18 }
 0x12c   : > { %669 = vrcp.f32 %v450_v19 }
 0x135   : > { %v668_v48 = vpop.eup %667 }
 0x136   : > { %v670_v50 = vpop.eup %669  ;;  %v453_v51 = vmul.f32 %v668_v48, %v664_v6 }
 0x137   : > { %v454_v53 = vmul.f32 %v670_v50, %v666_v7 }
 0x138   : > { %v491_v54 = vmul.f32 %v453_v51, %v803_v20  ;;  %v495_v55 = vmul.f32 %v453_v51, %v811_v24  ;;  %v499_v57 = vmul.f32 %v453_v51, %v819_v28  ;;  %v503_v59 = vmul.f32 %v453_v51, %v827_v32 }
 0x139   : > { %v507_v60 = vmul.f32 %v453_v51, %v398_v36  ;;  %v511_v61 = vmul.f32 %v453_v51, %v404_v40  ;;  %v515_v62 = vmul.f32 %v453_v51, %v410_v44  ;;  %v492_v63 = vmul.f32 %v454_v53, %v807_v22 }
 0x13a   : > { %493 = vst [vmem:[%s865_s30 + $0x90] sm:$0xff] %v491_v54  ;;  %497 = vst [vmem:[%s865_s30 + $0xa0] sm:$0xff] %v495_v55  ;;  %v496_v20 = vmul.f32 %v454_v53, %v815_v26  ;;  %v500_v24 = vmul.f32 %v454_v53, %v823_v30  ;;  %v504_v28 = vmul.f32 %v454_v53, %v831_v34 }
 0x13b   : > { %501 = vst [vmem:[%s865_s30 + $0xb0] sm:$0xff] %v499_v57  ;;  %505 = vst [vmem:[%s865_s30 + $0xc0] sm:$0xff] %v503_v59  ;;  %v508_v32 = vmul.f32 %v454_v53, %v837_v38  ;;  %v512_v22 = vmul.f32 %v454_v53, %v843_v42  ;;  %v516_v36 = vmul.f32 %v454_v53, %v849_v46 }
 0x13c   : > { %509 = vst [vmem:[%s865_s30 + $0xd0] sm:$0xff] %v507_v60  ;;  %513 = vst [vmem:[%s865_s30 + $0xe0] sm:$0xff] %v511_v61  ;;  %v455_v26 = vmul.f32 %v453_v51, %v805_v21  ;;  %v456_v30 = vmul.f32 %v454_v53, %v809_v23  ;;  %v459_v34 = vmul.f32 %v453_v51, %v813_v25 }
 0x13d   : > { %517 = vst [vmem:[%s865_s30 + $0xf0] sm:$0xff] %v515_v62  ;;  %494 = vst [vmem:[%s865_s30 + $0x98] sm:$0xff] %v492_v63  ;;  %v460_v38 = vmul.f32 %v454_v53, %v817_v27  ;;  %v463_v40 = vmul.f32 %v453_v51, %v821_v29  ;;  %v464_v42 = vmul.f32 %v454_v53, %v825_v31 }
 0x13e   : > { %498 = vst [vmem:[%s865_s30 + $0xa8] sm:$0xff] %v496_v20  ;;  %502 = vst [vmem:[%s865_s30 + $0xb8] sm:$0xff] %v500_v24  ;;  %v467_v21 = vmul.f32 %v453_v51, %v829_v33  ;;  %v468_v23 = vmul.f32 %v454_v53, %v833_v35  ;;  %v471_v25 = vmul.f32 %v453_v51, %v835_v37 }
 0x13f   : > { %506 = vst [vmem:[%s865_s30 + $0xc8] sm:$0xff] %v504_v28  ;;  %510 = vst [vmem:[%s865_s30 + $0xd8] sm:$0xff] %v508_v32  ;;  %v472_v27 = vmul.f32 %v454_v53, %v839_v39  ;;  %v475_v29 = vmul.f32 %v453_v51, %v841_v41  ;;  %v476_v31 = vmul.f32 %v454_v53, %v845_v43 }
 0x140   : > { %514 = vst [vmem:[%s865_s30 + $0xe8] sm:$0xff] %v512_v22  ;;  %518 = vst [vmem:[%s865_s30 + $0xf8] sm:$0xff] %v516_v36  ;;  %v479_v33 = vmul.f32 %v453_v51, %v847_v45  ;;  %v480_v35 = vmul.f32 %v454_v53, %v851_v47  ;;  %v483_v37 = vmul.f32 %v453_v51, %v853_v49 }
 0x141   : > { %457 = vst [vmem:[%s865_s30] sm:$0xff] %v455_v26  ;;  %458 = vst [vmem:[%s865_s30 + $0x8] sm:$0xff] %v456_v30  ;;  %v484_v39 = vmul.f32 %v454_v53, %v855_v52  ;;  %v487_v41 = vmul.f32 %v453_v51, %v857_v56  ;;  %v488_v44 = vmul.f32 %v454_v53, %v859_v58 }
 0x142   : > { %461 = vst [vmem:[%s865_s30 + $0x10] sm:$0xff] %v459_v34  ;;  %462 = vst [vmem:[%s865_s30 + $0x18] sm:$0xff] %v460_v38 }
 0x143   : > { %465 = vst [vmem:[%s865_s30 + $0x20] sm:$0xff] %v463_v40  ;;  %466 = vst [vmem:[%s865_s30 + $0x28] sm:$0xff] %v464_v42 }
 0x144   : > { %469 = vst [vmem:[%s865_s30 + $0x30] sm:$0xff] %v467_v21  ;;  %470 = vst [vmem:[%s865_s30 + $0x38] sm:$0xff] %v468_v23 }
 0x145   : > { %473 = vst [vmem:[%s865_s30 + $0x40] sm:$0xff] %v471_v25  ;;  %474 = vst [vmem:[%s865_s30 + $0x48] sm:$0xff] %v472_v27 }
 0x146   : > { %477 = vst [vmem:[%s865_s30 + $0x50] sm:$0xff] %v475_v29  ;;  %478 = vst [vmem:[%s865_s30 + $0x58] sm:$0xff] %v476_v31 }
 0x147   : > { %481 = vst [vmem:[%s865_s30 + $0x60] sm:$0xff] %v479_v33  ;;  %482 = vst [vmem:[%s865_s30 + $0x68] sm:$0xff] %v480_v35 }
 0x148   : > { %485 = vst [vmem:[%s865_s30 + $0x70] sm:$0xff] %v483_v37  ;;  %486 = vst [vmem:[%s865_s30 + $0x78] sm:$0xff] %v484_v39 }
 0x149   : > { %489 = vst [vmem:[%s865_s30 + $0x80] sm:$0xff] %v487_v41  ;;  %490 = vst [vmem:[%s865_s30 + $0x88] sm:$0xff] %v488_v44 }
 0x14a PF: > { %s12_s11 = sadd.s32 1, %s693_s11   ;;  %s940_s9 = smov %s689_s10 }
 0x14b   : > { %p9_p5 = scmp.ge.s32.totalorder %s12_s11, 4   ;;  %s941_s10 = smov %s943_s12 }
 0x14d   :  { %11 = sbr.rel (!%p9_p5) target bundleno = 2 (0x2), region = 58 }

</bundles_post_ra>
